<compile_context>
chip_gen: v7x
topology: tpu7x:2x2x1
jax: 0.10.0
libtpu: 0.0.40
codegen_flags: <defaults>
</compile_context>

<pallas_src>
import jax
import jax.numpy as jnp
from jax.experimental import pallas as pl
from jax.experimental.pallas import tpu as pltpu

_MiB = 1024 * 1024


def _sigmoid_1t(x):
    # sigmoid(x) == 0.5 * (tanh(x/2) + 1): one transcendental instead of
    # exp + divide; keeps the single-slot EUP off the critical path.
    return 0.5 * (jnp.tanh(0.5 * x) + 1.0)


def _conv1x1_sigmoid_kernel(x_ref, w_ref, b_ref, o_ref):
    # x_ref: (BN, C_in, TS), w_ref: (C_out, C_in), b_ref: (C_out, 1),
    # o_ref: (BN, C_out, TS).  BN is a small static batch block.
    w = w_ref[...]
    b = b_ref[...]
    for i in range(x_ref.shape[0]):            # static unroll over batch block
        acc = jnp.dot(w, x_ref[i], preferred_element_type=jnp.float32) + b
        o_ref[i] = _sigmoid_1t(acc).astype(o_ref.dtype)


def _pointwise_conv_sigmoid_kernel(x_ref, wt_ref, b_ref, o_ref):
    # x_ref: (BN, C_in), wt_ref: (C_in, C_out), b_ref: (1, C_out),
    # o_ref: (BN, C_out).  C_out (=192) is the lane dim -> lane-dense stores.
    acc = jnp.dot(x_ref[...], wt_ref[...], preferred_element_type=jnp.float32)
    acc = acc + b_ref[...]
    o_ref[...] = _sigmoid_1t(acc).astype(o_ref.dtype)


def _round_up(v, m):
    return ((v + m - 1) // m) * m


def _pick_tiles(n, c_in, c_out, hw, itemsize):
    """Spatial tile TS and batch block BN for the general (NCHW-native) path."""
    max_ts = 8192                         # multiple of 128; big per-step DMAs
    ts = hw if hw <= max_ts else max_ts

    # Batch block: grow per-step HBM traffic to ~4 MB (kernel is HBM-bound).
    target = 4 * _MiB
    per_b = (c_in + c_out) * ts * itemsize
    bn = max(1, min(n, 16, -(-target // per_b)))
    while bn > 1 and n % bn != 0:         # keep batch blocks exact (no ragged tail)
        bn -= 1

    # If everything collapses to one grid step, split the spatial axis so a
    # second step exists (lets both v7x TensorCores work; ~free elsewhere).
    if (pl.cdiv(n, bn) * pl.cdiv(hw, ts)) == 1 and hw >= 256:
        ts = _round_up(pl.cdiv(hw, 2), 128)
    return bn, ts


def _vmem_limit(in_tile_bytes, out_tile_bytes, weight_bytes):
    # Double-buffered in/out tiles + resident weights + headroom; clamp well
    # under the 64 MiB physical VMEM of a v7x TensorCore.
    need = 2 * (in_tile_bytes + out_tile_bytes) + weight_bytes + 4 * _MiB
    return int(min(max(need, 16 * _MiB), 48 * _MiB))


def conv1x1_sigmoid(x_nchw, weight_oihw, bias):
    """x_nchw: (N, C_in, H, W); weight_oihw: (C_out, C_in, 1, 1); bias: (C_out,)."""
    n, c_in, h, w = x_nchw.shape
    c_out = weight_oihw.shape[0]
    hw = h * w
    dt = x_nchw.dtype
    isz = jnp.dtype(dt).itemsize
    w_mat = weight_oihw.reshape(c_out, c_in)

    if hw == 1:
        # Pointwise path: (N, C_in) @ (C_in, C_out) -> (N, C_out); C_out is
        # the lane dim (lane-dense stores); NCHW reshape is free for HW == 1.
        x2d = x_nchw.reshape(n, c_in)
        wt = w_mat.T                                   # (C_in, C_out), tiny
        b2d = bias.reshape(1, c_out)
        bn = n if n <= 4096 else 4096
        out2d = pl.pallas_call(
            _pointwise_conv_sigmoid_kernel,
            out_shape=jax.ShapeDtypeStruct((n, c_out), dt),
            grid=(pl.cdiv(n, bn),),
            in_specs=[
                pl.BlockSpec((bn, c_in), lambda i: (i, 0)),
                pl.BlockSpec((c_in, c_out), lambda i: (0, 0)),   # VMEM-resident
                pl.BlockSpec((1, c_out), lambda i: (0, 0)),      # VMEM-resident
            ],
            out_specs=pl.BlockSpec((bn, c_out), lambda i: (i, 0)),
            compiler_params=pltpu.CompilerParams(
                dimension_semantics=("parallel",),
                vmem_limit_bytes=_vmem_limit(bn * c_in * isz,
                                             bn * c_out * isz,
                                             (c_in + 1) * c_out * isz),
            ),
        )(x2d, wt, b2d)
        return out2d.reshape(n, c_out, h, w)

    # General path: NCHW-native per-batch matmul over batch/spatial tiles.
    x_mat = x_nchw.reshape(n, c_in, hw)                # free (contiguous) reshape
    b_mat = bias.reshape(c_out, 1)
    bn, ts = _pick_tiles(n, c_in, c_out, hw, isz)
    grid = (pl.cdiv(n, bn), pl.cdiv(hw, ts))

    out_mat = pl.pallas_call(
        _conv1x1_sigmoid_kernel,
        out_shape=jax.ShapeDtypeStruct((n, c_out, hw), dt),
        grid=grid,
        in_specs=[
            pl.BlockSpec((bn, c_in, ts), lambda i, s: (i, 0, s)),
            pl.BlockSpec((c_out, c_in), lambda i, s: (0, 0)),    # VMEM-resident
            pl.BlockSpec((c_out, 1), lambda i, s: (0, 0)),       # VMEM-resident
        ],
        out_specs=pl.BlockSpec((bn, c_out, ts), lambda i, s: (i, 0, s)),
        compiler_params=pltpu.CompilerParams(
            dimension_semantics=("parallel", "parallel"),
            vmem_limit_bytes=_vmem_limit(bn * c_in * ts * isz,
                                         bn * c_out * ts * isz,
                                         (c_in + 1) * c_out * isz),
        ),
    )(x_mat, w_mat, b_mat)

    return out_mat.reshape(n, c_out, h, w)


if __name__ == "__main__":
    key = jax.random.PRNGKey(0)
    k_x, k_w, k_b, k_x2, k_x3 = jax.random.split(key, 5)

    # Shapes implied by the module: Conv2d(8, 192, 1x1) on x of shape (1, 8, 1, 1).
    N, C_IN, H, W = 1, 8, 1, 1
    C_OUT = 192

    # Deterministic parameter init (PyTorch-style uniform bound 1/sqrt(fan_in)).
    fan_in = C_IN * 1 * 1
    bound = 1.0 / (fan_in ** 0.5)
    weight = jax.random.uniform(k_w, (C_OUT, C_IN, 1, 1),
                                minval=-bound, maxval=bound, dtype=jnp.float32)
    bias = jax.random.uniform(k_b, (C_OUT,),
                              minval=-bound, maxval=bound, dtype=jnp.float32)

    def ref_fn(x):
        return jax.nn.sigmoid(
            jnp.einsum('nihw,oi->nohw', x, weight.reshape(C_OUT, C_IN))
            + bias.reshape(1, C_OUT, 1, 1))

    # 1) The module's literal shape (pointwise / lane-dense path).
    x = jax.random.normal(k_x, (N, C_IN, H, W), dtype=jnp.float32)
    out = conv1x1_sigmoid(x, weight, bias)
    jax.block_until_ready(out)
    assert out.shape == (N, C_OUT, H, W)
    assert jnp.allclose(out, ref_fn(x), atol=1e-5, rtol=1e-5)

    # 2) Small-HW multi-batch shape (batch-blocked tiled path).
    x2 = jax.random.normal(k_x2, (2, C_IN, 16, 16), dtype=jnp.float32)
    out2 = conv1x1_sigmoid(x2, weight, bias)
    jax.block_until_ready(out2)
    assert out2.shape == (2, C_OUT, 16, 16)
    assert jnp.allclose(out2, ref_fn(x2), atol=1e-5, rtol=1e-5)

    # 3) Larger spatial shape (multi-step spatial grid).
    x3 = jax.random.normal(k_x3, (4, C_IN, 32, 32), dtype=jnp.float32)
    out3 = conv1x1_sigmoid(x3, weight, bias)
    jax.block_until_ready(out3)
    assert out3.shape == (4, C_OUT, 32, 32)
    assert jnp.allclose(out3, ref_fn(x3), atol=1e-5, rtol=1e-5)

    print("KERNEL_OK")
</pallas_src>

<mosaic_0001>
module attributes {stable_mosaic.version = 11 : i64} {
  func.func @_pointwise_conv_sigmoid_kernel(%arg0: i32, %arg1: memref<1x8xf32, #tpu.memory_space<vmem>>, %arg2: memref<8x192xf32, #tpu.memory_space<vmem>>, %arg3: memref<1x192xf32, #tpu.memory_space<vmem>>, %arg4: memref<1x192xf32, #tpu.memory_space<vmem>>) attributes {dimension_semantics = [#tpu.dimension_semantics<parallel>], iteration_bounds = array<i64: 1>, scalar_prefetch = 0 : i64, scratch_operands = 0 : i64, tpu.core_type = #tpu.core_type<tc>, window_params = [{transform_indices = @transform_0, window_bounds = array<i64: 1, 8>}, {pipeline_mode = #tpu.pipeline_mode<synchronous>, transform_indices = @transform_1, window_bounds = array<i64: 8, 192>}, {pipeline_mode = #tpu.pipeline_mode<synchronous>, transform_indices = @transform_2, window_bounds = array<i64: 1, 192>}, {transform_indices = @transform_3, window_bounds = array<i64: 1, 192>}]} {
    %c0 = arith.constant 0 : index
    %c0_0 = arith.constant 0 : index
    %0 = vector.load %arg1[%c0, %c0_0] : memref<1x8xf32, #tpu.memory_space<vmem>>, vector<1x8xf32>
    %c0_1 = arith.constant 0 : index
    %c0_2 = arith.constant 0 : index
    %1 = vector.load %arg2[%c0_1, %c0_2] : memref<8x192xf32, #tpu.memory_space<vmem>>, vector<8x192xf32>
    %cst = arith.constant dense<0.000000e+00> : vector<1x192xf32>
    %2 = tpu.matmul %0, %1, %cst {dimension_numbers = #tpu.dot_dimension_numbers<[1], [0], [0], [1], [0, 0, 1, 1], [], []>} : vector<1x8xf32>, vector<8x192xf32>, vector<1x192xf32> -> vector<1x192xf32>
    %c0_3 = arith.constant 0 : index
    %c0_4 = arith.constant 0 : index
    %3 = vector.load %arg3[%c0_3, %c0_4] : memref<1x192xf32, #tpu.memory_space<vmem>>, vector<1x192xf32>
    %4 = arith.addf %2, %3 : vector<1x192xf32>
    %cst_5 = arith.constant 5.000000e-01 : f32
    %5 = vector.broadcast %cst_5 : f32 to vector<1x192xf32>
    %6 = arith.mulf %5, %4 : vector<1x192xf32>
    %7 = math.tanh %6 : vector<1x192xf32>
    %cst_6 = arith.constant 1.000000e+00 : f32
    %8 = vector.broadcast %cst_6 : f32 to vector<1x192xf32>
    %9 = arith.addf %7, %8 : vector<1x192xf32>
    %cst_7 = arith.constant 5.000000e-01 : f32
    %10 = vector.broadcast %cst_7 : f32 to vector<1x192xf32>
    %11 = arith.mulf %10, %9 : vector<1x192xf32>
    %c0_8 = arith.constant 0 : index
    %c0_9 = arith.constant 0 : index
    %12 = vector.load %arg4[%c0_8, %c0_9] : memref<1x192xf32, #tpu.memory_space<vmem>>, vector<1x192xf32>
    tpu.vector_store %arg4[%c0_8, %c0_9], %11 {strides = array<i32>} : memref<1x192xf32, #tpu.memory_space<vmem>>, vector<1x192xf32>,
    return
  }
  func.func @transform_0(%arg0: i32) -> (i32, i32) {
    %c0_i32 = arith.constant 0 : i32
    %c0_i32_0 = arith.constant 0 : i32
    return %arg0, %c0_i32 : i32, i32
  }
  func.func @transform_1(%arg0: i32) -> (i32, i32) {
    %c0_i32 = arith.constant 0 : i32
    %c0_i32_0 = arith.constant 0 : i32
    %c0_i32_1 = arith.constant 0 : i32
    return %c0_i32, %c0_i32_0 : i32, i32
  }
  func.func @transform_2(%arg0: i32) -> (i32, i32) {
    %c0_i32 = arith.constant 0 : i32
    %c0_i32_0 = arith.constant 0 : i32
    %c0_i32_1 = arith.constant 0 : i32
    return %c0_i32, %c0_i32_0 : i32, i32
  }
  func.func @transform_3(%arg0: i32) -> (i32, i32) {
    %c0_i32 = arith.constant 0 : i32
    %c0_i32_0 = arith.constant 0 : i32
    return %arg0, %c0_i32 : i32, i32
  }
}

</mosaic_0001>

<bundles_post_ra>
// kernel: tpu_custom_call.1
= control target key start
LH: loop header
LB: loop body
LE: loop exit
PB: predicated region body
PF: predicated region fallthrough
CT: control target
= control target key end

     0   :  { %8 = vsyncpa [#allocation3], 0  ;;  %s322_s0 = inlined_call_operand.hbm [shape: f32[1,8], index: 0, kind: input, shape index: {}]   ;;  %s323_s1 = inlined_call_operand.hbm [shape: f32[8,192], index: 1, kind: input, shape index: {}]   ;;  %s324_s2 = inlined_call_operand.vmem [shape: f32[1,192], index: 2, kind: input, shape index: {}]   ;;  %s325_s3 = inlined_call_operand.hbm [shape: f32[1,192], index: 3, kind: output, shape index: {}]  }
   0x1   :  { %9 = vsyncpa [#allocation6], 0 }
   0x2   :  { %10 = vsyncpa [#allocation4], 0  ;;  %s258_s12 = smov [#allocation2]   ;;  %s259_s14 = smov [#allocation5]  }
   0x3   :  { %s17_s13 = sshll.u32 %s258_s12, 4  ;;  %s27_s15 = sshll.u32 %s259_s14, 4  ;;  %s18_s13 = int_to_ptr.vmem [resolvable:$true] %s17_s13  ;;  %s28_s15 = int_to_ptr.vmem [resolvable:$true] %s27_s15 }
   0x4   :  { %s186_s18 = scalar_lea.hbm %s322_s0, 16 }
   0x5   :  { %p187_p0 = scmp.ne.s32.totalorder %s322_s0, %s186_s18  ;;  %p190_p1 = scmp.lt.u32.totalorder %s186_s18, %s322_s0 }
   0x7   :  { %p192_p2 = pnand %p190_p1, %p187_p0 }
   0x9   :  { %195 = shalt.err (!%p192_p2)
}
   0xa   :  { %s196_s23 = scalar_lea.vmem %s18_s13, 16  ;;  %s200_s24 = scalar_lea.vmem %s18_s13, 32 }
   0xb   :  { %p197_p3 = scmp.ne.s32.totalorder %s18_s13, %s196_s23  ;;  %p201_p4 = scmp.lt.s32.totalorder %s18_s13, %s18_s13 }
   0xc   :  { %p202_p5 = scmp.lt.s32.totalorder %s200_s24, %s196_s23 }
   0xe   :  { %p203_p6 = por %p202_p5, %p201_p4 }
  0x10   :  { %p204_p7 = pnand %p203_p6, %p197_p3 }
  0x12   :  { %207 = shalt.err (!%p204_p7)
}
  0x13   :  { %20 = dma.hbm_to_vmem [thread:$0]  %s322_s0, 16, %s18_s13, [#allocation3]  }
  0x14   :  { %s208_s29 = scalar_lea.hbm %s323_s1, 256 }
  0x15   :  { %p209_p8 = scmp.ne.s32.totalorder %s323_s1, %s208_s29  ;;  %p212_p9 = scmp.lt.u32.totalorder %s208_s29, %s323_s1 }
  0x17   :  { %p214_p10 = pnand %p212_p9, %p209_p8 }
  0x19   :  { %217 = shalt.err (!%p214_p10)
}
  0x1a   :  { %s218_s7 = scalar_lea.vmem %s28_s15, 256  ;;  %p223_p12 = scmp.lt.s32.totalorder %s28_s15, %s28_s15 }
  0x1b   :  { %p219_p11 = scmp.ne.s32.totalorder %s28_s15, %s218_s7  ;;  %p224_p13 = scmp.lt.s32.totalorder %s218_s7, %s218_s7 }
  0x1d   :  { %p225_p0 = por %p224_p13, %p223_p12 }
  0x1f   :  { %p226_p1 = pnand %p225_p0, %p219_p11 }
  0x21   :  { %229 = shalt.err (!%p226_p1)
}
  0x22   :  { %30 = dma.hbm_to_vmem [thread:$0]  %s323_s1, 256, %s28_s15, [#allocation6]  }
  0x23   :  { %252 = dma.done.wait [#allocation3], 16  }
  0x24   :  { %253 = vsyncadd [#allocation3], 4294967280 }
  0x25   :  { %254 = dma.done.wait [#allocation6], 256  }
  0x26   :  { %255 = vsyncadd [#allocation6], 4294967040  ;;  %v260_v0 = vmov 0.0   ;;  %v41_v1 = vld [vmem:[#allocation5 + $0x8] sm:$0xff]  ;;  %v40_v2 = vld [vmem:[#allocation5] sm:$0xff]  ;;  %vm54_vm0 = vcmask 64512   ;;  %v44_v4 = vlaneseq }
  0x27   :  { %122 = vmatprep.mubr.f32.mxu0 %v260_v0  ;;  %v39_v3 = vld [vmem:[#allocation2] sm:$0x1]  ;;  %58 = vmatprep.subr.mxu0 %v41_v1  ;;  %v42_v7 = vld [vmem:[%s324_s2] sm:$0x3]  ;;  %v261_v17 = vmov 1966171168  }
  0x28   :  { %59 = vmatpush1.msra.mxu0 %v40_v2  ;;  %v45_v5 = vshrl.u32 %v44_v4, 7  ;;  %v141_v18 = vunpack.c.l.s4 %v261_v17  ;;  %s262_s1 = smov [#allocation7]   ;;  %vm157_vm1 = vcmp.lt.s32.totalorder %v44_v4, 192 }
  0x29   :  { %176 = vmatmul.mubr.msk.f32.vlgmr.msra.gmra.mrb[0].mxu0 %vm54_vm0, %v39_v3  ;;  %s166_s2 = sshll.u32 %s262_s1, 4  ;;  %s167_s2 = int_to_ptr.vmem [resolvable:$true] %s166_s2 }
  0x2a   :  { %v46_v6 = vsub.s32 0, %v45_v5  ;;  %v50_v8 = vsub.s32 1, %v45_v5  ;;  %v142_v20 = vunpack.c.0.s8 %v141_v18  ;;  %s230_s11 = scalar_lea.vmem %s167_s2, 32  ;;  %p235_p3 = scmp.lt.s32.totalorder %s167_s2, %s167_s2 }
  0x2b   :  { %p231_p2 = scmp.ne.s32.totalorder %s167_s2, %s230_s11  ;;  %p236_p4 = scmp.lt.s32.totalorder %s230_s11, %s230_s11 }
  0x2c   :  { %v47_v9 = vrot.slane %v42_v7, %v46_v6  ;;  %v51_v10 = vrot.slane %v42_v7, %v50_v8  ;;  %v145_v26 = vsub.s32 %v142_v20, %v45_v5 }
  0x2d   :  { %p237_p5 = por %p236_p4, %p235_p3 }
  0x2f   :  { %p238_p6 = pnand %p237_p5, %p231_p2 }
  0xfc   :  { %v124_v11 = vpop.f32.mrb[0].mxu0 }
  0xfd   :  { %v125_v12 = vadd.f32 %v124_v11, %v47_v9  ;;  %v126_v13 = vpop.f32.mrb[1].mxu0 }
  0xfe   :  { %v127_v14 = vadd.f32 %v126_v13, %v51_v10 }
  0xff   :  { %v129_v15 = vmul.f32 0.5, %v125_v12 }
 0x100   :  { %v130_v16 = vmul.f32 0.5, %v127_v14 }
 0x101   :  { %182 = vtanh.f32 %v129_v15 }
 0x102   :  { %184 = vtanh.f32 %v130_v16 }
 0x10b   :  { %v183_v19 = vpop.eup %182 }
 0x10c   :  { %v185_v21 = vpop.eup %184  ;;  %v133_v22 = vadd.f32 1.0, %v183_v19 }
 0x10d   :  { %v134_v23 = vadd.f32 1.0, %v185_v21 }
 0x10e   :  { %v135_v24 = vmul.f32 0.5, %v133_v22 }
 0x10f   :  { %v136_v25 = vmul.f32 0.5, %v134_v23 }
 0x111   :  { %v139_v27 = vcombine.low %v135_v24, %v136_v25 }
 0x113   :  { %v146_v28 = vrot.slane %v139_v27, %v145_v26 }
 0x115   :  { %v153_v29 = vrot.slane %v146_v28, %v145_v26 }
 0x117   :  { %159 = vst.msk [vmem:[#allocation7] sm:$0x3] %vm157_vm1, %v153_v29 }
 0x118   :  { %241 = shalt.err (!%p238_p6)
}
 0x119   :  { %s242_s14 = scalar_lea.hbm %s325_s3, 32 }
 0x11a   :  { %p243_p7 = scmp.ne.s32.totalorder %s325_s3, %s242_s14  ;;  %p246_p8 = scmp.lt.u32.totalorder %s242_s14, %s325_s3 }
 0x11c   :  { %p248_p9 = pnand %p246_p8, %p243_p7 }
 0x11e   :  { %251 = shalt.err (!%p248_p9)
}
 0x11f   :  { %169 = dma.vmem_to_hbm [thread:$0]  %s167_s2, 32, %s325_s3, [#allocation4]  }
 0x120   :  { %256 = dma.done.wait [#allocation4], 32  }
 0x121   :  { %257 = vsyncadd [#allocation4], 4294967264 }
 0x122   :  { %173 = vsyncpa [#allocation3], 1 }
 0x123   :  { %174 = vsyncpa [#allocation6], 1 }
 0x124   :  { %175 = vsyncpa [#allocation4], 1 }

</bundles_post_ra>
